<compile_context>
chip_gen: v7x
topology: tpu7x:2x2x1
jax: 0.10.0
libtpu: 0.0.40
codegen_flags: <defaults>
</compile_context>

<pallas_src>
import numpy as np
import jax
import jax.numpy as jnp
from jax.experimental import pallas as pl
from jax.experimental.pallas import tpu as pltpu


# --------------------------------------------------------------------------
# VMEM planning
# --------------------------------------------------------------------------
_N_BODY_TEMPS = 6               # live (tb, D) f32 temporaries in the body
_ROW_TEMP_BYTES = 8 * 128 * 4   # (tb, 1) f32 row temps/acc, lane-padded to 128


def _round_up(x, m):
    return -(-x // m) * m


def _vmem_capacity_bytes():
    """Physical per-core VMEM; fall back to the smallest (v7x-like) capacity."""
    try:
        cap = int(pltpu.get_tpu_info().vmem_capacity_bytes)
        if cap >= (32 << 20):
            return cap
    except Exception:
        pass
    return 64 << 20


def _per_row_vmem_bytes(feat_dim, itemsize):
    # 2 input streams x 2 pipeline buffers of (tb, D) input dtype
    # + ~6 live (tb, D) f32 body temporaries (always f32, even for bf16 inputs)
    # + lane-padded (tb, 1) f32 row temporaries / accumulator
    return (2 * 2 * feat_dim * itemsize
            + _N_BODY_TEMPS * feat_dim * 4
            + _ROW_TEMP_BYTES)


def _vmem_limit_for(tb, feat_dim, itemsize, cap):
    need = tb * _per_row_vmem_bytes(feat_dim, itemsize) + (2 << 20)
    return int(min(max(need, 16 << 20), cap))


def _plan_tile(batch, feat_dim, itemsize, cap):
    """Largest safe batch tile (multiple of 8), rebalanced across tiles."""
    budget = max(cap - (12 << 20), 8 << 20)     # headroom for compiler scratch
    tb = budget // _per_row_vmem_bytes(feat_dim, itemsize)
    tb = int(min(tb, 8192))
    tb = max(8, (tb // 8) * 8)
    if batch <= tb:
        return max(8, _round_up(batch, 8))      # single (possibly ragged) tile
    num_tiles = -(-batch // tb)
    # Rebalance so the last tile is not mostly empty (no padded DMA is issued
    # either way; this just evens out per-step work).
    tb = min(tb, _round_up(-(-batch // num_tiles), 8))
    return tb


# --------------------------------------------------------------------------
# Kernel
# --------------------------------------------------------------------------
def _make_kernel(inv_t, batch, tb, tiles_per_core, needs_mask):
    def kernel(student_ref, teacher_ref, out_ref, acc_ref):
        c = pl.program_id(0)          # core axis ("parallel")
        i = pl.program_id(1)          # batch-tile axis ("arbitrary")

        @pl.when(i == 0)
        def _init():
            acc_ref[...] = jnp.zeros_like(acc_ref)

        s = student_ref[...].astype(jnp.float32) * inv_t
        t = teacher_ref[...].astype(jnp.float32) * inv_t

        # Teacher: stable unnormalized exp + per-row partition function.
        t_max = jnp.max(t, axis=-1, keepdims=True)
        t_shift = t - t_max
        t_exp = jnp.exp(t_shift)
        t_sum = jnp.sum(t_exp, axis=-1, keepdims=True)        # (tb, 1)

        # Student: stable sum-exp (log taken only on the (tb, 1) result).
        s_max = jnp.max(s, axis=-1, keepdims=True)
        s_shift = s - s_max
        s_sum = jnp.sum(jnp.exp(s_shift), axis=-1, keepdims=True)  # (tb, 1)

        # KL_row = sum_j p_j (log p_j - log q_j)
        #        = sum_j t_exp_j (t_shift_j - s_shift_j) / t_sum
        #          + log(s_sum / t_sum)
        # (the constant per-row term factors out of the weighted sum since
        #  sum_j p_j == 1, saving a full (tb, D) broadcast-add pass).
        row_num = jnp.sum(t_exp * (t_shift - s_shift), axis=-1, keepdims=True)
        row_kl = row_num / t_sum + jnp.log(s_sum / t_sum)      # (tb, 1)

        if needs_mask:
            # Ragged last tile / clamped duplicate tile: mask invalid rows with
            # a select so any inf/NaN from out-of-bounds data never reaches the
            # accumulator.
            row0 = (c * tiles_per_core + i) * tb
            rows = row0 + jax.lax.broadcasted_iota(jnp.int32, (tb, 1), 0)
            row_kl = jnp.where(rows < batch, row_kl, 0.0)

        acc_ref[...] += row_kl

        @pl.when(i == pl.num_programs(1) - 1)
        def _finalize():
            out_ref[0, 0] = jnp.sum(acc_ref[...])

    return kernel


# --------------------------------------------------------------------------
# Wrapper
# --------------------------------------------------------------------------
def feature_distribution_loss_pallas(student, teacher, temperature, *, tb=None):
    assert student.shape == teacher.shape, "student/teacher shapes must match"
    B, D = student.shape
    itemsize = jnp.dtype(student.dtype).itemsize
    cap = _vmem_capacity_bytes()

    if tb is None:
        tb = _plan_tile(B, D, itemsize, cap)
    else:
        assert tb > 0 and tb % 8 == 0, "batch tile must be a multiple of 8"
    # vmem limit always derived from the tb actually used.
    vmem_limit = _vmem_limit_for(tb, D, itemsize, cap)

    num_tiles = -(-B // tb)
    # Dual-TensorCore split (v7x / other megacore parts).  On single-core chips
    # the "parallel" axis just runs serially and is harmless.
    ncores = 2 if num_tiles >= 2 else 1
    tiles_per_core = -(-num_tiles // ncores)
    need_clamp = (ncores * tiles_per_core != num_tiles)
    needs_mask = (B % tb != 0) or need_clamp

    def in_map(c, i):
        t_idx = c * tiles_per_core + i
        if need_clamp:
            # Odd tile count: core 1's last logical tile duplicates a real tile
            # (its rows are fully masked in-kernel).
            t_idx = jnp.minimum(t_idx, num_tiles - 1)
        return (t_idx, 0)

    inv_t = 1.0 / float(temperature)
    kernel = _make_kernel(inv_t, B, tb, tiles_per_core, needs_mask)

    partials = pl.pallas_call(
        kernel,
        out_shape=jax.ShapeDtypeStruct((ncores, 1), jnp.float32),
        grid_spec=pltpu.PrefetchScalarGridSpec(
            num_scalar_prefetch=0,
            grid=(ncores, tiles_per_core),
            in_specs=[
                pl.BlockSpec((tb, D), in_map),          # student tile
                pl.BlockSpec((tb, D), in_map),          # teacher tile
            ],
            out_specs=pl.BlockSpec(
                (1, 1), lambda c, i: (c, 0),
                memory_space=pltpu.MemorySpace.SMEM,    # per-core partial sum
            ),
            scratch_shapes=[pltpu.VMEM((tb, 1), jnp.float32)],  # per-row acc
        ),
        compiler_params=pltpu.CompilerParams(
            dimension_semantics=("parallel", "arbitrary"),
            vmem_limit_bytes=vmem_limit,
        ),
    )(student, teacher)

    # Final T**2 / B scaling (B = original, unpadded batch).
    scale = float(temperature) * float(temperature) / float(B)
    return jnp.sum(partials) * jnp.float32(scale)


class FeatureDistributionLossJAX:
    """Mirror of the PyTorch module: holds the teacher-temperature schedule."""

    def __init__(self, nepochs, warmup_teacher_temp, teacher_temp,
                 warmup_teacher_temp_epochs):
        # TODO(synk): nn.MSELoss in the original module is constructed but never
        # used in forward(), so it is not translated.
        self.teacher_temp_schedule = np.concatenate((
            np.linspace(warmup_teacher_temp, teacher_temp,
                        warmup_teacher_temp_epochs),
            np.ones(nepochs - warmup_teacher_temp_epochs) * teacher_temp,
        ))

    def __call__(self, student_outputs, teacher_outputs, epoch):
        temp = float(self.teacher_temp_schedule[epoch])
        return feature_distribution_loss_pallas(student_outputs, teacher_outputs,
                                                temp)


def _reference(student, teacher, temp):
    p = jax.nn.softmax(teacher / temp, axis=-1)
    lq = jax.nn.log_softmax(student / temp, axis=-1)
    return jnp.sum(p * (jnp.log(p) - lq)) / student.shape[0] * temp ** 2


if __name__ == "__main__":
    # Small shapes: batch = 16 rows, feature dim = 256 (lane-aligned).
    B, D = 16, 256
    key = jax.random.PRNGKey(0)
    k1, k2 = jax.random.split(key)
    student = jax.random.normal(k1, (B, D), dtype=jnp.float32)
    teacher = jax.random.normal(k2, (B, D), dtype=jnp.float32)

    loss_mod = FeatureDistributionLossJAX(
        nepochs=100,
        warmup_teacher_temp=1.7,
        teacher_temp=0.23,
        warmup_teacher_temp_epochs=50,
    )
    epoch = 10

    loss = loss_mod(student, teacher, epoch)
    loss = jax.block_until_ready(loss)

    temp = float(loss_mod.teacher_temp_schedule[epoch])
    ref = jax.block_until_ready(_reference(student, teacher, temp))
    assert jnp.allclose(loss, ref, rtol=1e-4, atol=1e-5), (float(loss), float(ref))

    print("KERNEL_OK")
</pallas_src>

<mosaic_0001>
module attributes {stable_mosaic.version = 11 : i64} {
  func.func @kernel(%arg0: i32, %arg1: i32, %arg2: memref<16x256xf32, #tpu.memory_space<vmem>>, %arg3: memref<16x256xf32, #tpu.memory_space<vmem>>, %arg4: memref<1x1xf32, #tpu.memory_space<smem>>, %arg5: memref<16x1xf32, #tpu.memory_space<vmem>>) attributes {dimension_semantics = [#tpu.dimension_semantics<parallel>, #tpu.dimension_semantics<arbitrary>], iteration_bounds = array<i64: 1, 1>, scalar_prefetch = 0 : i64, scratch_operands = 1 : i64, tpu.core_type = #tpu.core_type<tc>, window_params = [{transform_indices = @transform_0, window_bounds = array<i64: 16, 256>}, {transform_indices = @transform_1, window_bounds = array<i64: 16, 256>}, {transform_indices = @transform_2, window_bounds = array<i64: 1, 1>}]} {
    %c0_i32 = arith.constant 0 : i32
    %0 = arith.cmpi eq, %arg1, %c0_i32 : i32
    %1 = arith.extui %0 : i1 to i32
    %c0_i32_0 = arith.constant 0 : i32
    %2 = arith.cmpi ne, %1, %c0_i32_0 : i32
    scf.if %2 {
      %cst_16 = arith.constant 0.000000e+00 : f32
      %37 = vector.broadcast %cst_16 : f32 to vector<16x1xf32>
      %c0_17 = arith.constant 0 : index
      %c0_18 = arith.constant 0 : index
      %38 = vector.load %arg5[%c0_17, %c0_18] : memref<16x1xf32, #tpu.memory_space<vmem>>, vector<16x1xf32>
      tpu.vector_store %arg5[%c0_17, %c0_18], %37 {strides = array<i32>} : memref<16x1xf32, #tpu.memory_space<vmem>>, vector<16x1xf32>,
    } else {
    }
    %c0 = arith.constant 0 : index
    %c0_1 = arith.constant 0 : index
    %3 = vector.load %arg2[%c0, %c0_1] : memref<16x256xf32, #tpu.memory_space<vmem>>, vector<16x256xf32>
    %cst = arith.constant 0.714285731 : f32
    %4 = vector.broadcast %cst : f32 to vector<16x256xf32>
    %5 = arith.mulf %3, %4 : vector<16x256xf32>
    %c0_2 = arith.constant 0 : index
    %c0_3 = arith.constant 0 : index
    %6 = vector.load %arg3[%c0_2, %c0_3] : memref<16x256xf32, #tpu.memory_space<vmem>>, vector<16x256xf32>
    %cst_4 = arith.constant 0.714285731 : f32
    %7 = vector.broadcast %cst_4 : f32 to vector<16x256xf32>
    %8 = arith.mulf %6, %7 : vector<16x256xf32>
    %cst_5 = arith.constant dense<0xFF800000> : vector<16xf32>
    %9 = vector.multi_reduction <maximumf>, %8, %cst_5 [1] : vector<16x256xf32> to vector<16xf32>
    %10 = vector.shape_cast %9 : vector<16xf32> to vector<16x1xf32>
    %11 = vector.broadcast %10 : vector<16x1xf32> to vector<16x256xf32>
    %12 = arith.subf %8, %11 : vector<16x256xf32>
    %13 = math.exp %12 : vector<16x256xf32>
    %cst_6 = arith.constant dense<0.000000e+00> : vector<16xf32>
    %14 = vector.multi_reduction <add>, %13, %cst_6 [1] : vector<16x256xf32> to vector<16xf32>
    %15 = vector.shape_cast %14 : vector<16xf32> to vector<16x1xf32>
    %cst_7 = arith.constant dense<0xFF800000> : vector<16xf32>
    %16 = vector.multi_reduction <maximumf>, %5, %cst_7 [1] : vector<16x256xf32> to vector<16xf32>
    %17 = vector.shape_cast %16 : vector<16xf32> to vector<16x1xf32>
    %18 = vector.broadcast %17 : vector<16x1xf32> to vector<16x256xf32>
    %19 = arith.subf %5, %18 : vector<16x256xf32>
    %20 = math.exp %19 : vector<16x256xf32>
    %cst_8 = arith.constant dense<0.000000e+00> : vector<16xf32>
    %21 = vector.multi_reduction <add>, %20, %cst_8 [1] : vector<16x256xf32> to vector<16xf32>
    %22 = vector.shape_cast %21 : vector<16xf32> to vector<16x1xf32>
    %23 = arith.subf %12, %19 : vector<16x256xf32>
    %24 = arith.mulf %13, %23 : vector<16x256xf32>
    %cst_9 = arith.constant dense<0.000000e+00> : vector<16xf32>
    %25 = vector.multi_reduction <add>, %24, %cst_9 [1] : vector<16x256xf32> to vector<16xf32>
    %26 = vector.shape_cast %25 : vector<16xf32> to vector<16x1xf32>
    %27 = arith.divf %26, %15 : vector<16x1xf32>
    %28 = arith.divf %22, %15 : vector<16x1xf32>
    %29 = math.log %28 : vector<16x1xf32>
    %30 = arith.addf %27, %29 : vector<16x1xf32>
    %c0_10 = arith.constant 0 : index
    %c0_11 = arith.constant 0 : index
    %31 = vector.load %arg5[%c0_10, %c0_11] : memref<16x1xf32, #tpu.memory_space<vmem>>, vector<16x1xf32>
    %32 = arith.addf %31, %30 : vector<16x1xf32>
    %c0_12 = arith.constant 0 : index
    %c0_13 = arith.constant 0 : index
    %33 = vector.load %arg5[%c0_12, %c0_13] : memref<16x1xf32, #tpu.memory_space<vmem>>, vector<16x1xf32>
    tpu.vector_store %arg5[%c0_12, %c0_13], %32 {strides = array<i32>} : memref<16x1xf32, #tpu.memory_space<vmem>>, vector<16x1xf32>,
    %c0_i32_14 = arith.constant 0 : i32
    %34 = arith.cmpi eq, %arg1, %c0_i32_14 : i32
    %35 = arith.extui %34 : i1 to i32
    %c0_i32_15 = arith.constant 0 : i32
    %36 = arith.cmpi ne, %35, %c0_i32_15 : i32
    scf.if %36 {
      %c0_16 = arith.constant 0 : index
      %c0_17 = arith.constant 0 : index
      %37 = vector.load %arg5[%c0_16, %c0_17] : memref<16x1xf32, #tpu.memory_space<vmem>>, vector<16x1xf32>
      %38 = vector.shape_cast %37 : vector<16x1xf32> to vector<1x16x1xf32>
      %cst_18 = arith.constant dense<0.000000e+00> : vector<1xf32>
      %39 = vector.multi_reduction <add>, %38, %cst_18 [1, 2] : vector<1x16x1xf32> to vector<1xf32>
      %40 = vector.shape_cast %39 : vector<1xf32> to vector<1x1x1xf32>
      %41 = vector.extract %40[0, 0, 0] : f32 from vector<1x1x1xf32>
      %c0_19 = arith.constant 0 : index
      %c0_20 = arith.constant 0 : index
      %42 = memref.load %arg4[%c0_19, %c0_20] : memref<1x1xf32, #tpu.memory_space<smem>>
      memref.store %41, %arg4[%c0_19, %c0_20] : memref<1x1xf32, #tpu.memory_space<smem>>
    } else {
    }
    return
  }
  func.func @transform_0(%arg0: i32, %arg1: i32) -> (i32, i32) {
    %c1_i32 = arith.constant 1 : i32
    %0 = arith.muli %arg0, %c1_i32 : i32
    %1 = arith.addi %0, %arg1 : i32
    %c0_i32 = arith.constant 0 : i32
    %c0_i32_0 = arith.constant 0 : i32
    return %1, %c0_i32 : i32, i32
  }
  func.func @transform_1(%arg0: i32, %arg1: i32) -> (i32, i32) {
    %c1_i32 = arith.constant 1 : i32
    %0 = arith.muli %arg0, %c1_i32 : i32
    %1 = arith.addi %0, %arg1 : i32
    %c0_i32 = arith.constant 0 : i32
    %c0_i32_0 = arith.constant 0 : i32
    return %1, %c0_i32 : i32, i32
  }
  func.func @transform_2(%arg0: i32, %arg1: i32) -> (i32, i32) {
    %c0_i32 = arith.constant 0 : i32
    %c0_i32_0 = arith.constant 0 : i32
    return %arg0, %c0_i32 : i32, i32
  }
}

</mosaic_0001>

<bundles_post_ra>
// kernel: tpu_custom_call.1
= control target key start
LH: loop header
LB: loop body
LE: loop exit
PB: predicated region body
PF: predicated region fallthrough
CT: control target
= control target key end

     0   :  { %7 = vsyncpa [#allocation4], 0  ;;  %s347_s0 = inlined_call_operand.hbm [shape: f32[16,256], index: 0, kind: input, shape index: {}]   ;;  %s348_s1 = inlined_call_operand.hbm [shape: f32[16,256], index: 1, kind: input, shape index: {}]   ;;  %s349_s2 = inlined_call_operand.hbm [shape: f32[1,1], index: 2, kind: output, shape index: {}]  }
   0x1   :  { %8 = vsyncpa [#allocation7], 0 }
   0x2   :  { %9 = vsyncpa [#allocation5], 0  ;;  %s284_s9 = smov [#allocation3]   ;;  %s224_s13 = scalar_lea.hbm %s347_s0, 512 }
   0x3   :  { %s20_s10 = sshll.u32 %s284_s9, 4  ;;  %p225_p0 = scmp.ne.s32.totalorder %s347_s0, %s224_s13  ;;  %s21_s10 = int_to_ptr.vmem [resolvable:$true] %s20_s10 }
   0x4   :  { %p228_p1 = scmp.lt.u32.totalorder %s224_s13, %s347_s0 }
   0x6   :  { %p230_p2 = pnand %p228_p1, %p225_p0 }
   0x8   :  { %233 = shalt.err (!%p230_p2)
}
   0x9   :  { %s234_s18 = scalar_lea.vmem %s21_s10, 512  ;;  %p239_p4 = scmp.lt.s32.totalorder %s21_s10, %s21_s10 }
   0xa   :  { %p235_p3 = scmp.ne.s32.totalorder %s21_s10, %s234_s18  ;;  %p240_p5 = scmp.lt.s32.totalorder %s234_s18, %s234_s18 }
   0xc   :  { %p241_p6 = por %p240_p5, %p239_p4 }
   0xe   :  { %p242_p7 = pnand %p241_p6, %p235_p3 }
  0x10   :  { %245 = shalt.err (!%p242_p7)
}
  0x11   :  { %s285_s19 = smov 256   ;;  %s286_s20 = smov 16  }
  0x12   :  { %26 = dma.hbm_to_vmem [thread:$0]  %s347_s0, 512, %s21_s10, [#allocation4], %s285_s19, %s285_s19, %s286_s20  }
  0x13   :  { %s287_s23 = smov [#allocation6]   ;;  %s246_s27 = scalar_lea.hbm %s348_s1, 512 }
  0x14   :  { %s37_s24 = sshll.u32 %s287_s23, 4  ;;  %p247_p8 = scmp.ne.s32.totalorder %s348_s1, %s246_s27  ;;  %s38_s24 = int_to_ptr.vmem [resolvable:$true] %s37_s24 }
  0x15   :  { %p250_p9 = scmp.lt.u32.totalorder %s246_s27, %s348_s1 }
  0x17   :  { %p252_p10 = pnand %p250_p9, %p247_p8 }
  0x19   :  { %255 = shalt.err (!%p252_p10)
}
  0x1a   :  { %s256_s4 = scalar_lea.vmem %s38_s24, 512  ;;  %p261_p12 = scmp.lt.s32.totalorder %s38_s24, %s38_s24 }
  0x1b   :  { %p257_p11 = scmp.ne.s32.totalorder %s38_s24, %s256_s4  ;;  %p262_p13 = scmp.lt.s32.totalorder %s256_s4, %s256_s4 }
  0x1d   :  { %p263_p0 = por %p262_p13, %p261_p12 }
  0x1f   :  { %p264_p1 = pnand %p263_p0, %p257_p11 }
  0x21   :  { %267 = shalt.err (!%p264_p1)
}
  0x22   :  { %43 = dma.hbm_to_vmem [thread:$0]  %s348_s1, 512, %s38_s24, [#allocation7], %s285_s19, %s285_s19, %s286_s20  }
  0x23   :  { %278 = dma.done.wait [#allocation4], 512  }
  0x24   :  { %279 = vsyncadd [#allocation4], 4294966784 }
  0x25   :  { %280 = dma.done.wait [#allocation7], 512  }
  0x26   :  { %281 = vsyncadd [#allocation7], 4294966784  ;;  %v69_v0 = vld [vmem:[#allocation6] sm:$0xff]  ;;  %v70_v1 = vld [vmem:[#allocation6 + $0x8] sm:$0xff]  ;;  %vm58_vm0 = vcmask 7168   ;;  %v288_v62 = vmov 0.0  }
  0x27   :  { %v61_v2 = vld [vmem:[#allocation3] sm:$0xff]  ;;  %v73_v3 = vmul.f32 0.71428573, %v69_v0  ;;  %v74_v4 = vmul.f32 0.71428573, %v70_v1  ;;  %v62_v5 = vld [vmem:[#allocation3 + $0x8] sm:$0xff] }
  0x28   :  { %v71_v6 = vld [vmem:[#allocation6 + $0x10] sm:$0xff]  ;;  %v65_v7 = vmul.f32 0.71428573, %v61_v2  ;;  %v66_v8 = vmul.f32 0.71428573, %v62_v5  ;;  %v72_v9 = vld [vmem:[#allocation6 + $0x18] sm:$0xff] }
  0x29   :  { %v63_v10 = vld [vmem:[#allocation3 + $0x10] sm:$0xff]  ;;  %v77_v11 = vmax.f32 %v73_v3, %v74_v4  ;;  %v75_v12 = vmul.f32 0.71428573, %v71_v6  ;;  %v76_v13 = vmul.f32 0.71428573, %v72_v9  ;;  %v64_v14 = vld [vmem:[#allocation3 + $0x18] sm:$0xff] }
  0x2a   :  { %v101_v15 = vmax.f32 %v65_v7, %v66_v8  ;;  %v67_v16 = vmul.f32 0.71428573, %v63_v10  ;;  %v68_v17 = vmul.f32 0.71428573, %v64_v14  ;;  %59 = vst.msk [vmem:[#allocation2] sm:$0xff] %vm58_vm0, %v288_v62  ;;  %60 = vst.msk [vmem:[#allocation2 + $0x8] sm:$0xff] %vm58_vm0, %v288_v62 }
  0x2b   :  { %78 = vmax.xlane.f32.xlu0 %v77_v11  ;;  %v80_v18 = vmax.f32 %v75_v12, %v76_v13  ;;  %s268_s8 = scalar_lea.hbm %s349_s2, 16 }
  0x2c   :  { %102 = vmax.xlane.f32.xlu1 %v101_v15  ;;  %v104_v19 = vmax.f32 %v67_v16, %v68_v17  ;;  %p269_p2 = scmp.ne.s32.totalorder %s349_s2, %s268_s8  ;;  %p272_p3 = scmp.lt.u32.totalorder %s268_s8, %s349_s2 }
  0x2e   :  { %p274_p4 = pnand %p272_p3, %p269_p2 }
  0x2f   :  { %81 = vmax.xlane.f32.xlu0 %v80_v18 }
  0x30   :  { %105 = vmax.xlane.f32.xlu1 %v104_v19 }
  0x31   :  { %v151_v11 = vld [vmem:[#allocation2] sm:$0xff]  ;;  %v152_v18 = vld [vmem:[#allocation2 + $0x8] sm:$0xff] }
  0xb8   :  { %v79_v20 = vpop.xlane.xlu0 %78 }
  0xb9   :  { %v83_v21 = vsub.f32 %v73_v3, %v79_v20  ;;  %v84_v22 = vsub.f32 %v74_v4, %v79_v20  ;;  %v103_v23 = vpop.xlane.xlu1 %102 }
  0xba   :  { %v107_v24 = vsub.f32 %v65_v7, %v103_v23  ;;  %v108_v25 = vsub.f32 %v66_v8, %v103_v23 }
  0xbb   :  { %v87_v26 = vmul.f32 1.442695, %v83_v21  ;;  %v89_v27 = vmul.f32 1.442695, %v84_v22 }
  0xbc   :  { %v111_v28 = vmul.f32 1.442695, %v107_v24  ;;  %v113_v29 = vmul.f32 1.442695, %v108_v25  ;;  %v82_v30 = vpop.xlane.xlu0 %81  ;;  %v125_v46 = vsub.f32 %v83_v21, %v107_v24  ;;  %v126_v47 = vsub.f32 %v84_v22, %v108_v25 }
  0xbd   :  { %200 = vpow2.f32 %v87_v26  ;;  %v85_v31 = vsub.f32 %v75_v12, %v82_v30  ;;  %v86_v32 = vsub.f32 %v76_v13, %v82_v30  ;;  %v106_v33 = vpop.xlane.xlu1 %105 }
  0xbe   :  { %202 = vpow2.f32 %v89_v27  ;;  %v109_v34 = vsub.f32 %v67_v16, %v106_v33  ;;  %v110_v35 = vsub.f32 %v68_v17, %v106_v33 }
  0xbf   :  { %204 = vpow2.f32 %v111_v28  ;;  %v91_v36 = vmul.f32 1.442695, %v85_v31  ;;  %v93_v37 = vmul.f32 1.442695, %v86_v32 }
  0xc0   :  { %206 = vpow2.f32 %v113_v29  ;;  %v115_v38 = vmul.f32 1.442695, %v109_v34  ;;  %v117_v39 = vmul.f32 1.442695, %v110_v35  ;;  %v127_v55 = vsub.f32 %v85_v31, %v109_v34 }
  0xc1   :  { %208 = vpow2.f32 %v91_v36  ;;  %v128_v56 = vsub.f32 %v86_v32, %v110_v35 }
  0xc2   :  { %210 = vpow2.f32 %v93_v37 }
  0xc3   :  { %212 = vpow2.f32 %v115_v38 }
  0xc4   :  { %214 = vpow2.f32 %v117_v39 }
  0xc7   :  { %v201_v40 = vpop.eup %200 }
  0xc8   :  { %v203_v41 = vpop.eup %202  ;;  %v129_v52 = vmul.f32 %v201_v40, %v125_v46 }
  0xc9   :  { %v205_v42 = vpop.eup %204  ;;  %v95_v43 = vadd.f32 %v203_v41, %v201_v40  ;;  %v130_v53 = vmul.f32 %v203_v41, %v126_v47 }
  0xca   :  { %v207_v44 = vpop.eup %206 }
  0xcb   :  { %v209_v45 = vpop.eup %208  ;;  %96 = vadd.xlane.f32.xlu0 %v95_v43  ;;  %v119_v48 = vadd.f32 %v207_v44, %v205_v42  ;;  %v133_v58 = vadd.f32 %v130_v53, %v129_v52 }
  0xcc   :  { %v211_v49 = vpop.eup %210  ;;  %v131_v59 = vmul.f32 %v209_v45, %v127_v55 }
  0xcd   :  { %v213_v50 = vpop.eup %212  ;;  %v98_v51 = vadd.f32 %v211_v49, %v209_v45  ;;  %v132_v60 = vmul.f32 %v211_v49, %v128_v56 }
  0xce   :  { %v215_v54 = vpop.eup %214 }
  0xcf   :  { %99 = vadd.xlane.f32.xlu1 %v98_v51  ;;  %120 = vadd.xlane.f32.xlu0 %v119_v48  ;;  %v122_v57 = vadd.f32 %v215_v54, %v213_v50  ;;  %v136_v61 = vadd.f32 %v132_v60, %v131_v59 }
  0xd3   :  { %134 = vadd.xlane.f32.xlu0 %v133_v58  ;;  %123 = vadd.xlane.f32.xlu1 %v122_v57 }
  0xd7   :  { %137 = vadd.xlane.f32.xlu1 %v136_v61 }
 0x158   :  { %v97_v63 = vpop.xlane.xlu0 %96 }
 0x159   :  { %216 = vrcp.f32 %v97_v63 }
 0x15c   :  { %v100_v0 = vpop.xlane.xlu1 %99  ;;  %v121_v2 = vpop.xlane.xlu0 %120 }
 0x15d   :  { %218 = vrcp.f32 %v100_v0 }
 0x160   :  { %v124_v5 = vpop.xlane.xlu1 %123  ;;  %v135_v8 = vpop.xlane.xlu0 %134 }
 0x163   :  { %v217_v1 = vpop.eup %216 }
 0x164   :  { %v143_v3 = vmul.f32 %v217_v1, %v121_v2  ;;  %v140_v10 = vmul.f32 %v217_v1, %v135_v8  ;;  %v138_v14 = vpop.xlane.xlu1 %137 }
 0x166   :  { %220 = vlog2.f32 %v143_v3 }
 0x167   :  { %v219_v4 = vpop.eup %218 }
 0x168   :  { %v144_v6 = vmul.f32 %v219_v4, %v124_v5  ;;  %v142_v17 = vmul.f32 %v219_v4, %v138_v14 }
 0x16a   :  { %222 = vlog2.f32 %v144_v6 }
 0x170   :  { %v221_v7 = vpop.eup %220 }
 0x171   :  { %v146_v9 = vmul.f32 0.6931472, %v221_v7 }
 0x173   :  { %v149_v12 = vadd.f32 %v146_v9, %v140_v10 }
 0x174   :  { %v223_v13 = vpop.eup %222 }
 0x175   :  { %v153_v15 = vadd.f32 %v151_v11, %v149_v12  ;;  %v148_v16 = vmul.f32 0.6931472, %v223_v13 }
 0x177   :  { %156 = vst.msk [vmem:[#allocation2] sm:$0xff] %vm58_vm0, %v153_v15  ;;  %v150_v19 = vadd.f32 %v148_v16, %v142_v17 }
 0x179   :  { %v154_v20 = vadd.f32 %v152_v18, %v150_v19 }
 0x17b   :  { %157 = vst.msk [vmem:[#allocation2 + $0x8] sm:$0xff] %vm58_vm0, %v154_v20 }
 0x17e   :  { %v161_v21 = vld [vmem:[#allocation2] sm:$0xff] }
 0x17f   :  { %v163_v23 = vsel %vm58_vm0, %v161_v21, 0.0 }
 0x182   :  { %v162_v22 = vld [vmem:[#allocation2 + $0x8] sm:$0xff] }
 0x183   :  { %v164_v24 = vsel %vm58_vm0, %v162_v22, 0.0 }
 0x184   :  { %v165_v25 = vadd.f32 %v164_v24, %v163_v23 }
 0x186   :  { %166 = vadd.xlane.f32.xlu0 %v165_v25 }
 0x213   :  { %v167_v26 = vpop.xlane.xlu0 %166 }
 0x214   :  { %v168_v27 = vrot.slane %v167_v26, 4 }
 0x216   :  { %v169_v28 = vadd.f32 %v168_v27, %v167_v26 }
 0x218   :  { %v170_v29 = vrot.slane %v169_v28, 2 }
 0x21a   :  { %v171_v30 = vadd.f32 %v170_v29, %v169_v28 }
 0x21c   :  { %v172_v31 = vrot.slane %v171_v30, 1 }
 0x21e   :  { %v173_v32 = vadd.f32 %v172_v31, %v171_v30 }
 0x220   :  { %192 = vpush %v173_v32 }
 0x251   :  { %s193_s1 = spop %192 }
 0x252   :  { %176 = sst [smem:[#allocation8]] %s193_s1 }
 0x253   :  { %277 = shalt.err (!%p274_p4)
}
 0x254   :  { %s289_s13 = smov [#allocation8]  }
 0x255   :  { %184 = dma.smem_to_hbm %s289_s13, 16, %s349_s2, [#allocation5]  }
 0x256   :  { %282 = dma.done.wait [#allocation5], 16  }
 0x257   :  { %283 = vsyncadd [#allocation5], 4294967280 }
 0x258   :  { %188 = sfence }
 0x259   :  { %189 = vsyncpa [#allocation4], 1 }
 0x25a   :  { %190 = vsyncpa [#allocation7], 1 }
 0x25b   :  { %191 = vsyncpa [#allocation5], 1 }

</bundles_post_ra>
